<compile_context>
chip_gen: v7x
topology: tpu7x:2x2x1
jax: 0.10.0
libtpu: 0.0.40
codegen_flags: <defaults>
</compile_context>

<pallas_src>
import jax
import jax.numpy as jnp
from jax.experimental import pallas as pl
from jax.experimental.pallas import tpu as pltpu

# ----------------------------- configuration --------------------------------
B = 2          # batch size
SEQ = 128      # sequence length c (attention context length)
HIDDEN = 64    # config.hidden_size (scaled down from 768)
EMB = 64       # emb_size of head/tail extractors (scaled down from 768)
HEADS = 4      # number of attention heads
N_E = 42       # hard-coded pad size in the reference module
S_NE = 4       # actual number of entities per example (s_ne)
R = S_NE * S_NE  # number of (head, tail) pairs per example
OFFSET = 1     # transformer_type == 'bert'
VOCAB = 100


# ------------------------------ Pallas kernel --------------------------------
def _fused_kernel(h_att_ref, t_att_ref, seq_ref, hsts_ref, w1_ref, w2_ref,
                  b_ref, o_ref):
    # h_att_ref / t_att_ref : (1, H, R, C)   head axis leading -> (R,C) tiles
    # seq_ref               : (1, C, D)
    # hsts_ref              : (1, R, 2D)     = [hs | ts]
    # w1_ref                : (2D, 2E)       = block-diag(Wh_hs, Wt_ts)
    # w2_ref                : (D, 2E)        = [Wh_rs | Wt_rs]
    # b_ref                 : (1, 2E)        = [bh | bt]
    # o_ref                 : (1, R, 2E)     lanes [0:E]=head, [E:2E]=tail
    h_att = h_att_ref[0]                      # (H, R, C)
    t_att = t_att_ref[0]                      # (H, R, C)
    prod = h_att * t_att                      # (H, R, C)  -- VPU

    # mean over heads: sums whole (R, C) tiles -> pure VPU adds, no relayout.
    n_heads = prod.shape[0]
    ht = jnp.sum(prod, axis=0) * (1.0 / n_heads)         # (R, C)

    # torch.nn.Threshold(0, 0): x if x > 0 else 0
    ht = jnp.maximum(ht, 0.0)
    denom = jnp.sum(ht, axis=1, keepdims=True) + 1e-10   # (R, 1)  XLU reduce
    ht = ht * pl.reciprocal(denom, approx=True)          # EUP, co-issues free

    # rs = contract('ld,rl->rd', sequence_output, ht_att) == ht_att @ seq_out
    rs = jnp.dot(ht, seq_ref[0], preferred_element_type=jnp.float32)  # (R, D)

    # fused head+tail extractor:
    #   lanes [0:E]  = tanh([hs|rs] @ Wh.T + bh)
    #   lanes [E:2E] = tanh([ts|rs] @ Wt.T + bt)
    acc = jnp.dot(hsts_ref[0], w1_ref[...], preferred_element_type=jnp.float32)
    acc = acc + jnp.dot(rs, w2_ref[...], preferred_element_type=jnp.float32)
    acc = acc + b_ref[...]
    o_ref[0] = jnp.tanh(acc).astype(o_ref.dtype)


# ----------------------------- Pallas wrapper --------------------------------
def fused_enhance_pallas(h_att, t_att, seq_out, hsts, w1, w2, b):
    Bn, H, Rr, C = h_att.shape
    D = seq_out.shape[-1]
    E2 = w1.shape[1]
    return pl.pallas_call(
        _fused_kernel,
        out_shape=jax.ShapeDtypeStruct((Bn, Rr, E2), seq_out.dtype),
        grid=(Bn,),
        in_specs=[
            pl.BlockSpec((1, H, Rr, C), lambda i: (i, 0, 0, 0)),
            pl.BlockSpec((1, H, Rr, C), lambda i: (i, 0, 0, 0)),
            pl.BlockSpec((1, C, D), lambda i: (i, 0, 0)),
            pl.BlockSpec((1, Rr, 2 * D), lambda i: (i, 0, 0)),
            pl.BlockSpec((2 * D, E2), lambda i: (0, 0)),
            pl.BlockSpec((D, E2), lambda i: (0, 0)),
            pl.BlockSpec((1, E2), lambda i: (0, 0)),
        ],
        out_specs=pl.BlockSpec((1, Rr, E2), lambda i: (i, 0, 0)),
        compiler_params=pltpu.CompilerParams(dimension_semantics=("parallel",)),
    )(h_att, t_att, seq_out, hsts, w1, w2, b)


# --------------------------------- JAX glue -----------------------------------
def _pool_entities(seq_i, att_i, entity_pos_i):
    """Per-entity pooling: logsumexp over mention embeddings, mean over
    mention attentions (matches get_hrt's inner loops).  Static Python spans."""
    c = att_i.shape[-1]
    embs, atts = [], []
    for e in entity_pos_i:
        if len(e) > 1:
            e_emb, e_att = [], []
            for (start, _end) in e:
                if start + OFFSET < c:
                    e_emb.append(seq_i[start + OFFSET])
                    e_att.append(att_i[:, start + OFFSET])
            if e_emb:
                emb = jax.nn.logsumexp(jnp.stack(e_emb, 0), axis=0)
                att = jnp.mean(jnp.stack(e_att, 0), axis=0)
            else:
                emb = jnp.zeros((seq_i.shape[-1],), seq_i.dtype)
                att = jnp.zeros((att_i.shape[0], c), att_i.dtype)
        else:
            start, _end = e[0]
            if start + OFFSET < c:
                emb = seq_i[start + OFFSET]
                att = att_i[:, start + OFFSET]
            else:
                emb = jnp.zeros((seq_i.shape[-1],), seq_i.dtype)
                att = jnp.zeros((att_i.shape[0], c), att_i.dtype)
        embs.append(emb)
        atts.append(att)
    return jnp.stack(embs, 0), jnp.stack(atts, 0)


def entity_enhance_forward(sequence_output, attention, entity_pos, hts,
                           Wh, bh, Wt, bt):
    """Equivalent of EntityEnhanceModel.get_hrt + head/tail extractors."""
    Bn, C, D = sequence_output.shape
    E = Wh.shape[0]

    hs_l, ts_l, ha_l, ta_l = [], [], [], []
    for i in range(Bn):
        embs, atts = _pool_entities(sequence_output[i], attention[i],
                                    entity_pos[i])
        ht_i = jnp.asarray(hts[i], dtype=jnp.int32)      # (R, 2)
        hs_l.append(jnp.take(embs, ht_i[:, 0], axis=0))
        ts_l.append(jnp.take(embs, ht_i[:, 1], axis=0))
        ha_l.append(jnp.take(atts, ht_i[:, 0], axis=0))
        ta_l.append(jnp.take(atts, ht_i[:, 1], axis=0))
    hs = jnp.stack(hs_l, 0)                              # (B, R, D)
    ts = jnp.stack(ts_l, 0)                              # (B, R, D)
    # (B, R, H, C) -> (B, H, R, C): clean (R, C=128) last-two-dim tiles
    h_att = jnp.transpose(jnp.stack(ha_l, 0), (0, 2, 1, 3))
    t_att = jnp.transpose(jnp.stack(ta_l, 0), (0, 2, 1, 3))

    # Fused weight blocks (out lanes [0:E]=head, [E:2E]=tail):
    #   w1 applies to [hs | ts] (K = 2D = 128), block-diagonal
    #   w2 applies to rs        (K = D  = 64)
    zero = jnp.zeros((D, E), Wh.dtype)
    w1 = jnp.concatenate(
        [jnp.concatenate([Wh[:, :D].T, zero], axis=1),
         jnp.concatenate([zero, Wt[:, :D].T], axis=1)], axis=0)   # (2D, 2E)
    w2 = jnp.concatenate([Wh[:, D:].T, Wt[:, D:].T], axis=1)      # (D, 2E)
    b = jnp.concatenate([bh, bt], axis=0).reshape(1, 2 * E)       # (1, 2E)

    hsts = jnp.concatenate([hs, ts], axis=-1)                     # (B, R, 2D)

    out = fused_enhance_pallas(h_att, t_att, sequence_output, hsts, w1, w2, b)
    head = out[..., :E].reshape(Bn, S_NE, S_NE, E)
    tail = out[..., E:].reshape(Bn, S_NE, S_NE, E)

    # Padded rows of the reference are all-zero extractor inputs -> tanh(bias).
    hs_out = jnp.broadcast_to(jnp.tanh(bh), (Bn, N_E, N_E, E))
    ts_out = jnp.broadcast_to(jnp.tanh(bt), (Bn, N_E, N_E, E))
    hs_out = hs_out.at[:, :S_NE, :S_NE, :].set(head)
    ts_out = ts_out.at[:, :S_NE, :S_NE, :].set(tail)
    return hs_out, ts_out


# ------------------------- plain-JAX reference (check) ------------------------
def reference_forward(sequence_output, attention, entity_pos, hts, Wh, bh, Wt, bt):
    Bn, C, D = sequence_output.shape
    hss, tss, rss = [], [], []
    for i in range(Bn):
        embs, atts = _pool_entities(sequence_output[i], attention[i],
                                    entity_pos[i])
        s_ne = embs.shape[0]
        ht_i = jnp.asarray(hts[i], dtype=jnp.int32)
        hs = jnp.take(embs, ht_i[:, 0], axis=0)
        ts_ = jnp.take(embs, ht_i[:, 1], axis=0)
        h_att = jnp.take(atts, ht_i[:, 0], axis=0)
        t_att = jnp.take(atts, ht_i[:, 1], axis=0)
        ht_att = jnp.mean(h_att * t_att, axis=1)
        ht_att = jnp.where(ht_att > 0.0, ht_att, 0.0)
        ht_att = ht_att / (jnp.sum(ht_att, axis=1, keepdims=True) + 1e-10)
        rs = jnp.einsum('ld,rl->rd', sequence_output[i], ht_att)

        def pad(x):
            o = jnp.zeros((N_E, N_E, D), x.dtype)
            return o.at[:s_ne, :s_ne, :].set(x.reshape(s_ne, s_ne, D))

        hss.append(pad(hs)); tss.append(pad(ts_)); rss.append(pad(rs))
    hss = jnp.stack(hss, 0); tss = jnp.stack(tss, 0); rss = jnp.stack(rss, 0)
    hs_out = jnp.tanh(jnp.concatenate([hss, rss], -1) @ Wh.T + bh)
    ts_out = jnp.tanh(jnp.concatenate([tss, rss], -1) @ Wt.T + bt)
    return hs_out, ts_out


# ----------------------------------- main -------------------------------------
if __name__ == "__main__":
    key = jax.random.PRNGKey(0)
    k_ids, k_emb, k_att, k_wh, k_bh, k_wt, k_bt = jax.random.split(key, 7)

    # inputs to the module's forward()
    input_ids = jax.random.randint(k_ids, (B, SEQ), 0, VOCAB)
    attention_mask = jnp.ones((B, SEQ), dtype=jnp.float32)

    # TODO(synk): process_long_input / external pretrained transformer
    # (self.model) has no Pallas equivalent; replaced with a deterministic
    # stand-in encoder (embedding lookup + softmax attention maps).
    emb_table = 0.1 * jax.random.normal(k_emb, (VOCAB, HIDDEN), jnp.float32)
    sequence_output = emb_table[input_ids]                       # (B, SEQ, HIDDEN)
    att_logits = jax.random.normal(k_att, (B, HEADS, SEQ, SEQ), jnp.float32)
    attention = jax.nn.softmax(att_logits, axis=-1)              # (B, H, SEQ, SEQ)

    # entity mention spans (static python structure, as in DocRED-style data)
    entity_pos = [
        [[(2, 3), (10, 12)], [(20, 21)], [(33, 35), (40, 41)], [(50, 52)]],
        [[(5, 6)], [(15, 17), (25, 26)], [(60, 62)], [(70, 71), (80, 82)]],
    ]
    hts = [[[a, b] for a in range(S_NE) for b in range(S_NE)] for _ in range(B)]

    # nn.Linear(2*hidden, emb) parameters (deterministic init)
    Wh = 0.05 * jax.random.normal(k_wh, (EMB, 2 * HIDDEN), jnp.float32)
    bh = 0.05 * jax.random.normal(k_bh, (EMB,), jnp.float32)
    Wt = 0.05 * jax.random.normal(k_wt, (EMB, 2 * HIDDEN), jnp.float32)
    bt = 0.05 * jax.random.normal(k_bt, (EMB,), jnp.float32)

    hs_out, ts_out = entity_enhance_forward(sequence_output, attention,
                                            entity_pos, hts, Wh, bh, Wt, bt)
    hs_out = jax.block_until_ready(hs_out)
    ts_out = jax.block_until_ready(ts_out)

    hs_ref, ts_ref = reference_forward(sequence_output, attention, entity_pos,
                                       hts, Wh, bh, Wt, bt)
    assert hs_out.shape == (B, N_E, N_E, EMB)
    assert ts_out.shape == (B, N_E, N_E, EMB)
    assert bool(jnp.allclose(hs_out, hs_ref, atol=2e-3, rtol=2e-3))
    assert bool(jnp.allclose(ts_out, ts_ref, atol=2e-3, rtol=2e-3))

    print("KERNEL_OK")
</pallas_src>

<mosaic_0001>
module attributes {stable_mosaic.version = 11 : i64} {
  func.func @_fused_kernel(%arg0: i32, %arg1: memref<1x4x16x128xf32, #tpu.memory_space<vmem>>, %arg2: memref<1x4x16x128xf32, #tpu.memory_space<vmem>>, %arg3: memref<1x128x64xf32, #tpu.memory_space<vmem>>, %arg4: memref<1x16x128xf32, #tpu.memory_space<vmem>>, %arg5: memref<128x128xf32, #tpu.memory_space<vmem>>, %arg6: memref<64x128xf32, #tpu.memory_space<vmem>>, %arg7: memref<1x128xf32, #tpu.memory_space<vmem>>, %arg8: memref<1x16x128xf32, #tpu.memory_space<vmem>>) attributes {dimension_semantics = [#tpu.dimension_semantics<parallel>], iteration_bounds = array<i64: 2>, scalar_prefetch = 0 : i64, scratch_operands = 0 : i64, tpu.core_type = #tpu.core_type<tc>, window_params = [{transform_indices = @transform_0, window_bounds = array<i64: 1, 4, 16, 128>}, {transform_indices = @transform_1, window_bounds = array<i64: 1, 4, 16, 128>}, {transform_indices = @transform_2, window_bounds = array<i64: 1, 128, 64>}, {transform_indices = @transform_3, window_bounds = array<i64: 1, 16, 128>}, {pipeline_mode = #tpu.pipeline_mode<synchronous>, transform_indices = @transform_4, window_bounds = array<i64: 128, 128>}, {pipeline_mode = #tpu.pipeline_mode<synchronous>, transform_indices = @transform_5, window_bounds = array<i64: 64, 128>}, {pipeline_mode = #tpu.pipeline_mode<synchronous>, transform_indices = @transform_6, window_bounds = array<i64: 1, 128>}, {transform_indices = @transform_7, window_bounds = array<i64: 1, 16, 128>}]} {
    %c0 = arith.constant 0 : index
    %c0_0 = arith.constant 0 : index
    %c0_1 = arith.constant 0 : index
    %c0_2 = arith.constant 0 : index
    %0 = vector.load %arg1[%c0, %c0_0, %c0_1, %c0_2] : memref<1x4x16x128xf32, #tpu.memory_space<vmem>>, vector<1x4x16x128xf32>
    %1 = vector.shape_cast %0 : vector<1x4x16x128xf32> to vector<4x16x128xf32>
    %c0_3 = arith.constant 0 : index
    %c0_4 = arith.constant 0 : index
    %c0_5 = arith.constant 0 : index
    %c0_6 = arith.constant 0 : index
    %2 = vector.load %arg2[%c0_3, %c0_4, %c0_5, %c0_6] : memref<1x4x16x128xf32, #tpu.memory_space<vmem>>, vector<1x4x16x128xf32>
    %3 = vector.shape_cast %2 : vector<1x4x16x128xf32> to vector<4x16x128xf32>
    %4 = arith.mulf %1, %3 : vector<4x16x128xf32>
    %cst = arith.constant dense<0.000000e+00> : vector<16x128xf32>
    %5 = vector.multi_reduction <add>, %4, %cst [0] : vector<4x16x128xf32> to vector<16x128xf32>
    %cst_7 = arith.constant 2.500000e-01 : f32
    %6 = vector.broadcast %cst_7 : f32 to vector<16x128xf32>
    %7 = arith.mulf %5, %6 : vector<16x128xf32>
    %cst_8 = arith.constant 0.000000e+00 : f32
    %8 = vector.broadcast %cst_8 : f32 to vector<16x128xf32>
    %9 = arith.maximumf %7, %8 : vector<16x128xf32>
    %cst_9 = arith.constant dense<0.000000e+00> : vector<16xf32>
    %10 = vector.multi_reduction <add>, %9, %cst_9 [1] : vector<16x128xf32> to vector<16xf32>
    %11 = vector.shape_cast %10 : vector<16xf32> to vector<16x1xf32>
    %cst_10 = arith.constant 1.000000e-10 : f32
    %12 = vector.broadcast %cst_10 : f32 to vector<16x1xf32>
    %13 = arith.addf %11, %12 : vector<16x1xf32>
    %14 = tpu.reciprocal %13 {approx = true} : vector<16x1xf32> -> vector<16x1xf32>
    %15 = vector.broadcast %14 : vector<16x1xf32> to vector<16x128xf32>
    %16 = arith.mulf %9, %15 : vector<16x128xf32>
    %c0_11 = arith.constant 0 : index
    %c0_12 = arith.constant 0 : index
    %c0_13 = arith.constant 0 : index
    %17 = vector.load %arg3[%c0_11, %c0_12, %c0_13] : memref<1x128x64xf32, #tpu.memory_space<vmem>>, vector<1x128x64xf32>
    %18 = vector.shape_cast %17 : vector<1x128x64xf32> to vector<128x64xf32>
    %cst_14 = arith.constant dense<0.000000e+00> : vector<16x64xf32>
    %19 = tpu.matmul %16, %18, %cst_14 {dimension_numbers = #tpu.dot_dimension_numbers<[1], [0], [0], [1], [0, 0, 1, 1], [], []>} : vector<16x128xf32>, vector<128x64xf32>, vector<16x64xf32> -> vector<16x64xf32>
    %c0_15 = arith.constant 0 : index
    %c0_16 = arith.constant 0 : index
    %c0_17 = arith.constant 0 : index
    %20 = vector.load %arg4[%c0_15, %c0_16, %c0_17] : memref<1x16x128xf32, #tpu.memory_space<vmem>>, vector<1x16x128xf32>
    %21 = vector.shape_cast %20 : vector<1x16x128xf32> to vector<16x128xf32>
    %c0_18 = arith.constant 0 : index
    %c0_19 = arith.constant 0 : index
    %22 = vector.load %arg5[%c0_18, %c0_19] : memref<128x128xf32, #tpu.memory_space<vmem>>, vector<128x128xf32>
    %cst_20 = arith.constant dense<0.000000e+00> : vector<16x128xf32>
    %23 = tpu.matmul %21, %22, %cst_20 {dimension_numbers = #tpu.dot_dimension_numbers<[1], [0], [0], [1], [0, 0, 1, 1], [], []>} : vector<16x128xf32>, vector<128x128xf32>, vector<16x128xf32> -> vector<16x128xf32>
    %c0_21 = arith.constant 0 : index
    %c0_22 = arith.constant 0 : index
    %24 = vector.load %arg6[%c0_21, %c0_22] : memref<64x128xf32, #tpu.memory_space<vmem>>, vector<64x128xf32>
    %cst_23 = arith.constant dense<0.000000e+00> : vector<16x128xf32>
    %25 = tpu.matmul %19, %24, %cst_23 {dimension_numbers = #tpu.dot_dimension_numbers<[1], [0], [0], [1], [0, 0, 1, 1], [], []>} : vector<16x64xf32>, vector<64x128xf32>, vector<16x128xf32> -> vector<16x128xf32>
    %26 = arith.addf %23, %25 : vector<16x128xf32>
    %c0_24 = arith.constant 0 : index
    %c0_25 = arith.constant 0 : index
    %27 = vector.load %arg7[%c0_24, %c0_25] : memref<1x128xf32, #tpu.memory_space<vmem>>, vector<1x128xf32>
    %28 = vector.broadcast %27 : vector<1x128xf32> to vector<16x128xf32>
    %29 = arith.addf %26, %28 : vector<16x128xf32>
    %30 = math.tanh %29 : vector<16x128xf32>
    %c0_26 = arith.constant 0 : index
    %c0_27 = arith.constant 0 : index
    %c0_28 = arith.constant 0 : index
    %31 = vector.load %arg8[%c0_26, %c0_27, %c0_28] : memref<1x16x128xf32, #tpu.memory_space<vmem>>, vector<1x16x128xf32>
    %32 = vector.shape_cast %31 : vector<1x16x128xf32> to vector<16x128xf32>
    %33 = vector.shape_cast %30 : vector<16x128xf32> to vector<1x16x128xf32>
    tpu.vector_store %arg8[%c0_26, %c0_27, %c0_28], %33 {strides = array<i32>} : memref<1x16x128xf32, #tpu.memory_space<vmem>>, vector<1x16x128xf32>,
    return
  }
  func.func @transform_0(%arg0: i32) -> (i32, i32, i32, i32) {
    %c0_i32 = arith.constant 0 : i32
    %c0_i32_0 = arith.constant 0 : i32
    %c0_i32_1 = arith.constant 0 : i32
    %c0_i32_2 = arith.constant 0 : i32
    return %arg0, %c0_i32, %c0_i32_0, %c0_i32_1 : i32, i32, i32, i32
  }
  func.func @transform_1(%arg0: i32) -> (i32, i32, i32, i32) {
    %c0_i32 = arith.constant 0 : i32
    %c0_i32_0 = arith.constant 0 : i32
    %c0_i32_1 = arith.constant 0 : i32
    %c0_i32_2 = arith.constant 0 : i32
    return %arg0, %c0_i32, %c0_i32_0, %c0_i32_1 : i32, i32, i32, i32
  }
  func.func @transform_2(%arg0: i32) -> (i32, i32, i32) {
    %c0_i32 = arith.constant 0 : i32
    %c0_i32_0 = arith.constant 0 : i32
    %c0_i32_1 = arith.constant 0 : i32
    return %arg0, %c0_i32, %c0_i32_0 : i32, i32, i32
  }
  func.func @transform_3(%arg0: i32) -> (i32, i32, i32) {
    %c0_i32 = arith.constant 0 : i32
    %c0_i32_0 = arith.constant 0 : i32
    %c0_i32_1 = arith.constant 0 : i32
    return %arg0, %c0_i32, %c0_i32_0 : i32, i32, i32
  }
  func.func @transform_4(%arg0: i32) -> (i32, i32) {
    %c0_i32 = arith.constant 0 : i32
    %c0_i32_0 = arith.constant 0 : i32
    %c0_i32_1 = arith.constant 0 : i32
    return %c0_i32, %c0_i32_0 : i32, i32
  }
  func.func @transform_5(%arg0: i32) -> (i32, i32) {
    %c0_i32 = arith.constant 0 : i32
    %c0_i32_0 = arith.constant 0 : i32
    %c0_i32_1 = arith.constant 0 : i32
    return %c0_i32, %c0_i32_0 : i32, i32
  }
  func.func @transform_6(%arg0: i32) -> (i32, i32) {
    %c0_i32 = arith.constant 0 : i32
    %c0_i32_0 = arith.constant 0 : i32
    %c0_i32_1 = arith.constant 0 : i32
    return %c0_i32, %c0_i32_0 : i32, i32
  }
  func.func @transform_7(%arg0: i32) -> (i32, i32, i32) {
    %c0_i32 = arith.constant 0 : i32
    %c0_i32_0 = arith.constant 0 : i32
    %c0_i32_1 = arith.constant 0 : i32
    return %arg0, %c0_i32, %c0_i32_0 : i32, i32, i32
  }
}

</mosaic_0001>

<bundles_post_ra>
// kernel: tpu_custom_call.1
= control target key start
LH: loop header
LB: loop body
LE: loop exit
PB: predicated region body
PF: predicated region fallthrough
CT: control target
= control target key end

     0   :  { %12 = vsyncpa [#allocation3], 0  ;;  %s1627_s0 = inlined_call_operand.vmem [shape: f32[2,4,16,128], index: 0, kind: input, shape index: {}]   ;;  %s1628_s1 = inlined_call_operand.vmem [shape: f32[2,4,16,128], index: 1, kind: input, shape index: {}]   ;;  %s1629_s2 = inlined_call_operand.vmem [shape: f32[2,128,64], index: 2, kind: input, shape index: {}]   ;;  %s1630_s3 = inlined_call_operand.hbm [shape: f32[2,16,128], index: 3, kind: input, shape index: {}]   ;;  %s1631_s4 = inlined_call_operand.vmem [shape: f32[128,128], index: 4, kind: input, shape index: {}]   ;;  %s1632_s5 = inlined_call_operand.hbm [shape: f32[64,128], index: 5, kind: input, shape index: {}]   ;;  %s1633_s6 = inlined_call_operand.vmem [shape: f32[1,128], index: 6, kind: input, shape index: {}]   ;;  %s1634_s7 = inlined_call_operand.hbm [shape: f32[2,16,128], index: 7, kind: output, shape index: {}]  }
   0x1   :  { %14 = vsyncpa [#allocation3 + $0x1], 0 }
   0x2   :  { %15 = vsyncpa [#allocation6], 0 }
   0x3   :  { %16 = vsyncpa [#allocation4], 0 }
   0x4   :  { %18 = vsyncpa [#allocation4 + $0x1], 0  ;;  %s1329_s24 = smov 0   ;;  %s1331_s25 = smov 0  }
   0x5   :  { %s1333_s26 = smov 0   ;;  %s1335_s27 = smov 0  }
   0x6 LB: > { %s1350_s28 = sadd.s32 4294967295, %s1280_s27   ;;  %s836_s29 = sadd.s32 4294967294, %s1280_s27   ;;  %s1280_s27 = sphi %s1335_s27, %s1658_s27   ;;  %s1276_s26 = sphi %s1333_s26, %s1657_s26   ;;  %s1272_s25 = sphi %s1331_s25, %s1656_s25   ;;  %s1268_s24 = sphi %s1329_s24, %s1655_s24  }
   0x7   : > { %p122_p0 = scmp.ne.s32.totalorder %s1272_s25, %s1268_s24  ;;  %p1635_p1 = scmp.eq.s32.totalorder %s1350_s28, 0 }
   0x8   : > { %p215_p3 = scmp.eq.s32.totalorder %s836_s29, 1  ;;  %p837_p5 = scmp.ge.s32.totalorder %s1280_s27, 1 }
   0x9   : > { %p1359_p4 = por %p1635_p1, %p122_p0  ;;  %p222_p7 = scmp.lt.s32.totalorder %s1280_s27, 3 }
   0xa   : > { %p1364_p6 = por %p215_p3, %p122_p0  ;;  %s1282_s10 = smov [#allocation5]  }
   0xb   : > { %s1640_s30 = scalar_select %p1359_p4, 1, 0 }
   0xc   : > { %s1641_s8 = scalar_select %p1364_p6, 1, 0 }
   0xd   : > { %p1369_p8 = pnand %p837_p5, %p222_p7  ;;  %s237_s11 = sshll.u32 %s1282_s10, 4  ;;  %s1373_s11 = int_to_ptr.vmem [resolvable:$true] %s237_s11 }
   0xe   : > { %s1385_s13 = sadd.s32 1, %s1280_s27   ;;  %s109_s14 = sadd.s32 1, %s1276_s26 }
   0xf   : > { %s1642_s9 = scalar_select %p1369_p8, 1, 0 }
  0x10   : > { %p1091_p9 = pneg %p1369_p8  ;;  %s106_s15 = ssub.s32 %s1280_s27, %s1385_s13 }
  0x11   : > { %s1152_s18 = scalar_lea.hbm %s1632_s5, 1024 }
  0x12   : > { %p1380_p11 = pnand %p1091_p9, %p1635_p1  ;;  %p1153_p12 = scmp.ne.s32.totalorder %s1632_s5, %s1152_s18 }
  0x13   : > { %p1159_p5 = scmp.lt.u32.totalorder %s1152_s18, %s1632_s5 }
  0x14   : > { %p1154_p13 = pneg %p1380_p11 }
  0x16   : > { %p1155_p0 = pnand %p1154_p13, %p1153_p12 }
  0x18   : > { %p1156_p3 = pneg %p1155_p0 }
  0x1a   : > { %p1161_p7 = pnand %p1159_p5, %p1156_p3 }
  0x1c   : > { %1164 = shalt.err (!%p1161_p7)
}
  0x1d   : > { %s1165_s23 = scalar_lea.vmem %s1373_s11, 1024  ;;  %p1173_p2 = scmp.lt.s32.totalorder %s1373_s11, %s1373_s11 }
  0x1e   : > { %p1166_p9 = scmp.ne.s32.totalorder %s1373_s11, %s1165_s23  ;;  %p1174_p6 = scmp.lt.s32.totalorder %s1165_s23, %s1165_s23 }
  0x20   : > { %p1168_p10 = pnand %p1166_p9, %p1154_p13  ;;  %p1175_p4 = por %p1174_p6, %p1173_p2 }
  0x22   : > { %p1169_p1 = pneg %p1168_p10 }
  0x24   : > { %p1176_p8 = pnand %p1175_p4, %p1169_p1 }
  0x26   : > { %1179 = shalt.err (!%p1176_p8)
}
  0x27   : > { %s1638_s29 = smov 128   ;;  %s1284_s10 = smov 8  }
  0x28   : > { %1094 = dma.hbm_to_vmem [thread:$0]  (!%p1380_p11), %s1632_s5, 1024, %s1373_s11, [#allocation6], %s1638_s29, %s1638_s29, %s1284_s10  }
  0x29   : > { %p107_p1 = scmp.eq.s32.totalorder %s106_s15, 0  ;;  %p116_p2 = scmp.ne.s32.totalorder %s1276_s26, %s1272_s25 }
  0x2a   : > { %p117_p4 = scmp.eq.s32.totalorder %s1280_s27, 0  ;;  %p1104_p6 = scmp.lt.s32.totalorder %s1280_s27, 2 }
  0x2b   : > { %s1419_s18 = scalar_select %p107_p1, %s1276_s26, %s109_s14  }
  0x2c   : > { %p118_p8 = por %p117_p4, %p116_p2  ;;  %p1644_p10 = scmp.eq.s32.totalorder %s1350_s28, 1 }
  0x2d   : > { %s278_s12 = sand.u32 1, %s1276_s26   ;;  %s861_s20 = sshll.u32 %s1280_s27, 8 }
  0x2e   : > { %p1423_p12 = por %p1644_p10, %p116_p2  ;;  %s840_s21 = sshll.u32 %s278_s12, 4 }
  0x2f   : > { %s1432_s16 = scalar_lea.hbm %s1630_s3, %s861_s20  ;;  %s282_s11 = scalar_lea.vmem [#allocation2], %s840_s21 }
  0x30   : > { %s289_s14 = sshll.u32 %s282_s11, 4  ;;  %p1434_p11 = pnand %p1104_p6, %p118_p8  ;;  %s1438_s14 = int_to_ptr.vmem [resolvable:$true] %s289_s14 }
  0x31   : > { %s1440_s17 = scalar_lea.sflag [#allocation3], %s278_s12  ;;  %s1180_s29 = scalar_lea.hbm %s1432_s16, 256 }
  0x32   : > { %p1181_p13 = scmp.ne.s32.totalorder %s1432_s16, %s1180_s29  ;;  %p1182_p0 = pneg %p1434_p11 }
  0x33   : > { %s1185_s22 = scalar_lea.hbm %s1630_s3, 512  ;;  %p1186_p7 = scmp.lt.u32.totalorder %s1432_s16, %s1630_s3 }
  0x34   : > { %p1183_p3 = pnand %p1182_p0, %p1181_p13  ;;  %p1187_p9 = scmp.lt.u32.totalorder %s1185_s22, %s1180_s29 }
  0x35   : > { %p1189_p2 = scmp.lt.u32.totalorder %s1180_s29, %s1432_s16 }
  0x36   : > { %p1184_p5 = pneg %p1183_p3  ;;  %p1188_p1 = por %p1187_p9, %p1186_p7 }
  0x38   : > { %p1190_p4 = por %p1189_p2, %p1188_p1 }
  0x3a   : > { %p1191_p6 = pnand %p1190_p4, %p1184_p5 }
  0x3c   : > { %1194 = shalt.err (!%p1191_p6)
}
  0x3d   : > { %s1195_s12 = scalar_lea.vmem %s1438_s14, 256  ;;  %s1285_s20 = smov [#allocation2]  }
  0x3e   : > { %p1196_p8 = scmp.ne.s32.totalorder %s1438_s14, %s1195_s12  ;;  %s1200_s21 = sshll.u32 %s1285_s20, 4  ;;  %s1201_s21 = int_to_ptr.vmem [resolvable:$false] %s1200_s21 }
  0x3f   : > { %s1202_s23 = scalar_lea.vmem %s1201_s21, 512  ;;  %p1203_p3 = scmp.lt.s32.totalorder %s1438_s14, %s1201_s21 }
  0x40   : > { %p1198_p10 = pnand %p1196_p8, %p1182_p0  ;;  %p1204_p7 = scmp.lt.s32.totalorder %s1202_s23, %s1195_s12 }
  0x42   : > { %p1199_p13 = pneg %p1198_p10  ;;  %p1205_p9 = por %p1204_p7, %p1203_p3 }
  0x44   : > { %p1206_p1 = pnand %p1205_p9, %p1199_p13 }
  0x46   : > { %1209 = shalt.err (!%p1206_p1)
}
  0x47   : > { %s1647_s29 = smov 128   ;;  %p1648_p0 = scmp.ne.s32.totalorder %s1642_s9, 0 }
  0x48   : > { %1098 = dma.hbm_to_vmem [thread:$0]  (!%p1434_p11), %s1432_s16, 256, %s1438_s14, %s1440_s17, %s1647_s29, %s1647_s29, %s1284_s10  }
  0x49   : > { %301 = sbr.rel (%p1648_p0) target bundleno = 753 (0x2f1), region = 48  ;;  %s1474_s22 = sand.u32 (!%p1648_p0), 1, %s1272_s25  }
  0x4a   : > { %s1639_s11 = sshll.u32 (!%p1648_p0), %s1474_s22, 4  ;;  %s304_s12 = scalar_lea.sflag (!%p1648_p0), [#allocation3], %s1474_s22 }
  0x4b   : > { %s1480_s15 = scalar_lea.vmem (!%p1648_p0), [#allocation2], %s1639_s11  ;;  %p1649_p5 = scmp.ne.s32.totalorder (!%p1648_p0), %s1640_s30, 0 }
  0x50   : > { %1255 = dma.done.wait (%p1649_p5), %s304_s12, 256  }
  0x51   : > { %1257 = vsyncadd (%p1649_p5), %s304_s12, 4294967040  ;;  %p1650_p11 = scmp.eq.s32.totalorder %s1350_s28, 0 }
  0x53   : > { %1259 = dma.done.wait (%p1650_p11), [#allocation6], 1024   ;;  %p1651_p2 = pmov %p1650_p11 }
  0x54   : > { %p357_p4 = scmp.lt.s32.totalorder %s1350_s28, 1  ;;  %v525_v58 = vld [vmem:[#allocation5] sm:$0xff]  ;;  %v526_v59 = vld [vmem:[#allocation5 + $0x8] sm:$0xff]  ;;  %v527_v60 = vld [vmem:[#allocation5 + $0x10] sm:$0xff]  ;;  %vm533_vm0 = vcmask 523264   ;;  %s865_s29 = sshll.u32 %s1350_s28, 8 }
  0x55   : > { %1261 = vsyncadd (%p1651_p2), [#allocation6], 4294966272  ;;  %v1033_v61 = vpack.c.bf16 %v526_v59, %v525_v58  ;;  %v528_v62 = vld [vmem:[#allocation5 + $0x18] sm:$0xff]  ;;  %s1652_s12 = sshll.u32 %s1474_s22, 4  ;;  %s704_s14 = scalar_lea.sflag [#allocation4], %s1474_s22 }
  0x56   : > { %s358_s9 = scalar_select %p357_p4, %s1350_s28, 1  ;;  %v1037_v63 = vpack.c.bf16 %v528_v62, %v527_v60 }
  0x57   : > { %1034 = vmatprep.subr.bf16.mxu1 %v1033_v61  ;;  %s1286_s28 = smov [#allocation7]  }
  0x58   : > { %s862_s10 = sshll.u32 %s358_s9, 6  ;;  %s864_s23 = sshll.u32 %s358_s9, 7  ;;  %1036 = vmatpush3.bf16.msra.mxu1 %v1033_v61 }
  0x59   : > { %s361_s17 = scalar_lea.vmem %s1627_s0, %s862_s10  ;;  %s366_s30 = scalar_lea.vmem %s1628_s1, %s862_s10  ;;  %1038 = vmatprep.subr.bf16.mxu1 %v1037_v63 }
  0x5a   : > { %v372_v0 = vld [vmem:[%s361_s17] sm:$0xff]  ;;  %v374_v1 = vld [vmem:[%s361_s17 + $0x10] sm:$0xff]  ;;  %s1501_s11 = scalar_lea.vmem %s1629_s2, %s864_s23  ;;  %v373_v10 = vld [vmem:[%s361_s17 + $0x8] sm:$0xff]  ;;  %s1214_s20 = sshll.u32 %s1286_s28, 4  ;;  %s1215_s20 = int_to_ptr.vmem [resolvable:$false] %s1214_s20 }
  0x5b   : > { %v376_v2 = vld [vmem:[%s361_s17 + $0x20] sm:$0xff]  ;;  %v378_v3 = vld [vmem:[%s361_s17 + $0x30] sm:$0xff]  ;;  %v375_v12 = vld [vmem:[%s361_s17 + $0x18] sm:$0xff]  ;;  %s1216_s21 = scalar_lea.vmem %s1215_s20, 512 }
  0x5c   : > { %v380_v4 = vld [vmem:[%s366_s30] sm:$0xff]  ;;  %v382_v5 = vld [vmem:[%s366_s30 + $0x10] sm:$0xff]  ;;  %v377_v13 = vld [vmem:[%s361_s17 + $0x28] sm:$0xff]  ;;  %1040 = vmatpush3.bf16.msra.mxu1 %v1037_v63 }
  0x5d   : > { %v384_v6 = vld [vmem:[%s366_s30 + $0x20] sm:$0xff]  ;;  %v386_v7 = vld [vmem:[%s366_s30 + $0x30] sm:$0xff]  ;;  %v388_v8 = vmul.f32 %v380_v4, %v372_v0  ;;  %v390_v9 = vmul.f32 %v382_v5, %v374_v1  ;;  %v379_v14 = vld [vmem:[%s361_s17 + $0x38] sm:$0xff] }
  0x5e   : > { %v392_v11 = vmul.f32 %v384_v6, %v376_v2  ;;  %v394_v15 = vmul.f32 %v386_v7, %v378_v3  ;;  %v381_v17 = vld [vmem:[%s366_s30 + $0x8] sm:$0xff]  ;;  %v383_v18 = vld [vmem:[%s366_s30 + $0x18] sm:$0xff]  ;;  %v416_v24 = vld [vmem:[%s1501_s11] sm:$0xff] }
  0x5f   : > { %v396_v16 = vadd.f32 %v390_v9, %v388_v8  ;;  %v385_v19 = vld [vmem:[%s366_s30 + $0x28] sm:$0xff]  ;;  %v387_v20 = vld [vmem:[%s366_s30 + $0x38] sm:$0xff]  ;;  %v389_v21 = vmul.f32 %v381_v17, %v373_v10  ;;  %v391_v22 = vmul.f32 %v383_v18, %v375_v12  ;;  %v418_v28 = vld [vmem:[%s1501_s11 + $0x10] sm:$0xff] }
  0x60   : > { %v393_v23 = vmul.f32 %v385_v19, %v377_v13  ;;  %v417_v25 = vld [vmem:[%s1501_s11 + $0x8] sm:$0xff]  ;;  %v419_v29 = vld [vmem:[%s1501_s11 + $0x18] sm:$0xff]  ;;  %v395_v30 = vmul.f32 %v387_v20, %v379_v14  ;;  %v420_v33 = vld [vmem:[%s1501_s11 + $0x20] sm:$0xff] }
  0x61   : > { %v397_v26 = vadd.f32 %v396_v16, %v392_v11  ;;  %v1001_v27 = vpack.c.bf16 %v417_v25, %v416_v24  ;;  %v399_v31 = vadd.f32 %v391_v22, %v389_v21  ;;  %v1005_v32 = vpack.c.bf16 %v419_v29, %v418_v28  ;;  %v421_v34 = vld [vmem:[%s1501_s11 + $0x28] sm:$0xff]  ;;  %v422_v40 = vld [vmem:[%s1501_s11 + $0x30] sm:$0xff]  ;;  %v423_v41 = vld [vmem:[%s1501_s11 + $0x38] sm:$0xff] }
  0x62   : > { %v1009_v38 = vpack.c.bf16 %v421_v34, %v420_v33  ;;  %v1013_v44 = vpack.c.bf16 %v423_v41, %v422_v40  ;;  %v424_v46 = vld [vmem:[%s1501_s11 + $0x40] sm:$0xff]  ;;  %v425_v47 = vld [vmem:[%s1501_s11 + $0x48] sm:$0xff]  ;;  %v426_v49 = vld [vmem:[%s1501_s11 + $0x50] sm:$0xff] }
  0x63   : > { %v398_v35 = vadd.f32 %v397_v26, %v394_v15  ;;  %1002 = vmatprep.subr.bf16.mxu0 %v1001_v27  ;;  %v400_v36 = vadd.f32 %v399_v31, %v393_v23  ;;  %v1017_v48 = vpack.c.bf16 %v425_v47, %v424_v46  ;;  %v427_v50 = vld [vmem:[%s1501_s11 + $0x58] sm:$0xff]  ;;  %v428_v52 = vld [vmem:[%s1501_s11 + $0x60] sm:$0xff]  ;;  %v429_v53 = vld [vmem:[%s1501_s11 + $0x68] sm:$0xff] }
  0x64   : > { %1004 = vmatpush3.bf16.msra.mxu0 %v1001_v27  ;;  %v1021_v51 = vpack.c.bf16 %v427_v50, %v426_v49  ;;  %v430_v54 = vld [vmem:[%s1501_s11 + $0x70] sm:$0xff]  ;;  %v1025_v55 = vpack.c.bf16 %v429_v53, %v428_v52  ;;  %v431_v56 = vld [vmem:[%s1501_s11 + $0x78] sm:$0xff]  ;;  %v529_v0 = vld [vmem:[#allocation5 + $0x20] sm:$0xff]  ;;  %s356_s11 = scalar_lea.vmem [#allocation7], %s1652_s12 }
  0x65   : > { %v1509_v37 = vmul.f32 0.25, %v398_v35  ;;  %1006 = vmatprep.subr.bf16.mxu0 %v1005_v32  ;;  %v401_v39 = vadd.f32 %v400_v36, %v395_v30  ;;  %v1029_v57 = vpack.c.bf16 %v431_v56, %v430_v54  ;;  %v530_v1 = vld [vmem:[#allocation5 + $0x28] sm:$0xff]  ;;  %v531_v3 = vld [vmem:[#allocation5 + $0x30] sm:$0xff]  ;;  %v532_v4 = vld [vmem:[#allocation5 + $0x38] sm:$0xff]  ;;  %s717_s9 = sshll.u32 %s356_s11, 4  ;;  %s1583_s9 = int_to_ptr.vmem [resolvable:$true] %s717_s9 }
  0x66   : > { %v1041_v2 = vpack.c.bf16 %v530_v1, %v529_v0  ;;  %v1045_v5 = vpack.c.bf16 %v532_v4, %v531_v3  ;;  %v509_v14 = vld [vmem:[%s1631_s4] sm:$0xff]  ;;  %v510_v15 = vld [vmem:[%s1631_s4 + $0x8] sm:$0xff]  ;;  %v511_v17 = vld [vmem:[%s1631_s4 + $0x10] sm:$0xff]  ;;  %s1210_s17 = scalar_lea.vmem %s1583_s9, 256  ;;  %p1217_p13 = scmp.lt.s32.totalorder %s1583_s9, %s1215_s20 }
  0x67   : > { %v404_v42 = vmax.f32 %v1509_v37, 0.0  ;;  %v403_v43 = vmul.f32 0.25, %v401_v39  ;;  %v1049_v16 = vpack.c.bf16 %v510_v15, %v509_v14  ;;  %v512_v18 = vld [vmem:[%s1631_s4 + $0x18] sm:$0xff]  ;;  %v507_v22 = vld [vmem:[%s1480_s15] sm:$0xff]  ;;  %v514_v24 = vld [vmem:[%s1631_s4 + $0x28] sm:$0xff]  ;;  %p1211_p6 = scmp.ne.s32.totalorder %s1583_s9, %s1210_s17  ;;  %p1218_p3 = scmp.lt.s32.totalorder %s1216_s21, %s1210_s17 }
  0x68   : > { %1008 = vmatpush3.bf16.msra.mxu0 %v1005_v32  ;;  %1042 = vmatprep.subr.bf16.mxu1 %v1041_v2  ;;  %v1053_v21 = vpack.c.bf16 %v512_v18, %v511_v17  ;;  %v513_v23 = vld [vmem:[%s1631_s4 + $0x20] sm:$0xff]  ;;  %v515_v26 = vld [vmem:[%s1631_s4 + $0x30] sm:$0xff]  ;;  %v516_v27 = vld [vmem:[%s1631_s4 + $0x38] sm:$0xff] }
  0x69   : > { %406 = vadd.xlane.f32.xlu0 %v404_v42  ;;  %1010 = vmatprep.subr.bf16.mxu0 %v1009_v38  ;;  %v405_v45 = vmax.f32 %v403_v43, 0.0  ;;  %v1057_v25 = vpack.c.bf16 %v514_v24, %v513_v23  ;;  %v1061_v28 = vpack.c.bf16 %v516_v27, %v515_v26  ;;  %v517_v29 = vld [vmem:[%s1631_s4 + $0x40] sm:$0xff]  ;;  %v518_v30 = vld [vmem:[%s1631_s4 + $0x48] sm:$0xff]  ;;  %v519_v32 = vld [vmem:[%s1631_s4 + $0x50] sm:$0xff]  ;;  %p1212_p8 = pnand %p1211_p6, %p1423_p12  ;;  %p1219_p7 = por %p1218_p3, %p1217_p13 }
  0x6a   : > { %1044 = vmatpush3.bf16.msra.mxu1 %v1041_v2  ;;  %v1065_v31 = vpack.c.bf16 %v518_v30, %v517_v29  ;;  %v520_v33 = vld [vmem:[%s1631_s4 + $0x58] sm:$0xff]  ;;  %v521_v35 = vld [vmem:[%s1631_s4 + $0x60] sm:$0xff]  ;;  %v522_v36 = vld [vmem:[%s1631_s4 + $0x68] sm:$0xff] }
  0x6b   : > { %1046 = vmatprep.subr.bf16.mxu1 %v1045_v5  ;;  %v1069_v34 = vpack.c.bf16 %v520_v33, %v519_v32  ;;  %v1073_v37 = vpack.c.bf16 %v522_v36, %v521_v35  ;;  %v524_v39 = vld [vmem:[%s1631_s4 + $0x78] sm:$0xff]  ;;  %p1213_p10 = pneg %p1212_p8 }
  0x6c   : > { %1012 = vmatpush3.bf16.msra.mxu0 %v1009_v38  ;;  %v523_v38 = vld [vmem:[%s1631_s4 + $0x70] sm:$0xff]  ;;  %v508_v41 = vld [vmem:[%s1480_s15 + $0x8] sm:$0xff]  ;;  %s1581_s15 = scalar_lea.hbm %s1634_s7, %s865_s29 }
  0x6d   : > { %408 = vadd.xlane.f32.xlu0 %v405_v45  ;;  %1014 = vmatprep.subr.bf16.mxu0 %v1013_v44  ;;  %v1077_v40 = vpack.c.bf16 %v524_v39, %v523_v38  ;;  %p1220_p9 = pnand %p1219_p7, %p1213_p10 }
  0x6e   : > { %1048 = vmatpush3.bf16.msra.mxu1 %v1045_v5 }
  0x6f   : > { %1050 = vmatprep.subr.bf16.mxu1 %v1049_v16 }
  0x70   : > { %1016 = vmatpush3.bf16.msra.mxu0 %v1013_v44 }
  0x71   : > { %1018 = vmatprep.subr.bf16.mxu0 %v1017_v48 }
  0x74   : > { %1020 = vmatpush3.bf16.msra.mxu0 %v1017_v48 }
  0x75   : > { %1022 = vmatprep.subr.bf16.mxu0 %v1021_v51 }
  0x78   : > { %1024 = vmatpush3.bf16.msra.mxu0 %v1021_v51 }
  0x79   : > { %1026 = vmatprep.subr.bf16.mxu0 %v1025_v55 }
  0x7c   : > { %1028 = vmatpush3.bf16.msra.mxu0 %v1025_v55 }
  0x7d   : > { %1030 = vmatprep.subr.bf16.mxu0 %v1029_v57 }
  0x80   : > { %1032 = vmatpush3.bf16.msra.mxu0 %v1029_v57 }
  0xf6   : > { %v407_v6 = vpop.xlane.xlu0 %406 }
  0xf7   : > { %v410_v7 = vadd.f32 1e-10, %v407_v6 }
  0xf9   : > { %1144 = vrcp.f32 %v410_v7 }
  0xfa   : > { %v409_v8 = vpop.xlane.xlu0 %408 }
  0xfb   : > { %v411_v9 = vadd.f32 1e-10, %v409_v8 }
  0xfd   : > { %1146 = vrcp.f32 %v411_v9 }
 0x103   : > { %v1145_v10 = vpop.eup %1144 }
 0x104   : > { %v414_v11 = vmul.f32 %v1145_v10, %v404_v42  ;;  %v855_v42 = vld [vmem:[%s1633_s6] ss:$0 sm:$0xff] }
 0x106   : > { %944 = vmatprep.mubr.f32.mxu0 %v414_v11 }
 0x107   : > { %v1147_v12 = vpop.eup %1146 }
 0x108   : > { %v415_v13 = vmul.f32 %v1147_v12, %v405_v45 }
 0x10a   : > { %945 = vmatmul.mubr.f32.vlgmr.msra.gmra.mrb[0].mxu0 %v415_v13 }
 0x1dd   : > { %v946_v19 = vpop.f32.mrb[0].mxu0 }
 0x1de   : > { %v498_v20 = vpop.f32.mrb[1].mxu0 }
 0x1df   : > { %963 = vmatprep.mubr.msk.f32.mxu1 %vm533_vm0, %v498_v20 }
 0x1e0   : > { %964 = vmatmul.mubr.msk.f32.vlgmr.msra.gmra.mrb[0].mxu1 %vm533_vm0, %v946_v19 }
 0x1e1   : > { %1052 = vmatpush3.bf16.msra.mxu1 %v1049_v16  ;;  %998 = vmatprep.mubr.f32.mxu1 %v507_v22 }
 0x1e2   : > { %1054 = vmatprep.subr.bf16.mxu1 %v1053_v21 }
 0x1e5   : > { %1056 = vmatpush3.bf16.msra.mxu1 %v1053_v21 }
 0x1e6   : > { %1058 = vmatprep.subr.bf16.mxu1 %v1057_v25 }
 0x1e9   : > { %1060 = vmatpush3.bf16.msra.mxu1 %v1057_v25 }
 0x1ea   : > { %1062 = vmatprep.subr.bf16.mxu1 %v1061_v28 }
 0x1ed   : > { %1064 = vmatpush3.bf16.msra.mxu1 %v1061_v28 }
 0x1ee   : > { %1066 = vmatprep.subr.bf16.mxu1 %v1065_v31 }
 0x1f1   : > { %1068 = vmatpush3.bf16.msra.mxu1 %v1065_v31 }
 0x1f2   : > { %1070 = vmatprep.subr.bf16.mxu1 %v1069_v34 }
 0x1f5   : > { %1072 = vmatpush3.bf16.msra.mxu1 %v1069_v34 }
 0x1f6   : > { %1074 = vmatprep.subr.bf16.mxu1 %v1073_v37 }
 0x1f9   : > { %1076 = vmatpush3.bf16.msra.mxu1 %v1073_v37 }
 0x1fa   : > { %1078 = vmatprep.subr.bf16.mxu1 %v1077_v40 }
 0x1fd   : > { %1080 = vmatpush3.bf16.msra.mxu1 %v1077_v40 }
 0x200   : > { %999 = vmatmul.mubr.f32.vlgmr.msra.gmra.mrb[0].mxu1 %v508_v41 }
 0x2d3   : > { %v1000_v43 = vpop.f32.mrb[0].mxu1 }
 0x2d4   : > { %v698_v44 = vadd.f32 %v1000_v43, %v855_v42  ;;  %v681_v45 = vpop.f32.mrb[1].mxu1 }
 0x2d5   : > { %v697_v46 = vadd.f32 %v855_v42, %v681_v45 }
 0x2d6   : > { %1148 = vtanh.f32 %v698_v44 }
 0x2d7   : > { %1150 = vtanh.f32 %v697_v46 }
 0x2e0   : > { %v1149_v47 = vpop.eup %1148 }
 0x2e1   : > { %v1151_v48 = vpop.eup %1150  ;;  %702 = vst [vmem:[%s356_s11 + $0x8] sm:$0xff] %v1149_v47 }
 0x2e2   : > { %701 = vst [vmem:[%s356_s11] sm:$0xff] %v1151_v48 }
 0x2e3   : > { %1223 = shalt.err (!%p1220_p9)
}
 0x2e4   : > { %s1224_s30 = scalar_lea.hbm %s1581_s15, 256  ;;  %s1228_s12 = scalar_lea.hbm %s1634_s7, 512 }
 0x2e5   : > { %p1225_p1 = scmp.ne.s32.totalorder %s1581_s15, %s1224_s30  ;;  %p1229_p11 = scmp.lt.u32.totalorder %s1581_s15, %s1634_s7 }
 0x2e6   : > { %p1230_p2 = scmp.lt.u32.totalorder %s1228_s12, %s1224_s30  ;;  %p1232_p6 = scmp.lt.u32.totalorder %s1224_s30, %s1581_s15 }
 0x2e7   : > { %p1226_p0 = pnand %p1225_p1, %p1423_p12 }
 0x2e8   : > { %p1231_p4 = por %p1230_p2, %p1229_p11 }
 0x2e9   : > { %p1227_p5 = pneg %p1226_p0 }
 0x2ea   : > { %p1233_p8 = por %p1232_p6, %p1231_p4 }
 0x2ec   : > { %p1234_p10 = pnand %p1233_p8, %p1227_p5 }
 0x2ee   : > { %1237 = shalt.err (!%p1234_p10)
}
 0x2ef   : > { %s1287_s16 = smov 128   ;;  %s1288_s17 = smov 8  }
 0x2f0   : > { %1089 = dma.vmem_to_hbm [thread:$0]  (%p1423_p12), %s1583_s9, 256, %s1581_s15, %s704_s14, %s1287_s16, %s1287_s16, %s1288_s17  }
 0x2f1 PF: > { %s732_s28 = sand.u32 1, %s1268_s24   ;;  %p1653_p13 = scmp.ne.s32.totalorder %s1641_s8, 0 }
 0x2f2   : > { %p1654_p3 = scmp.ge.s32.totalorder %s1280_s27, 2  ;;  %s733_s20 = scalar_lea.sflag [#allocation4], %s732_s28 }
 0x2f4   : > { %p1100_p7 = pnand %p1654_p3, %p1653_p13 }
 0x2f6   : > { %1263 = dma.done.wait (!%p1100_p7), %s733_s20, 256  }
 0x2f7   : > { %1265 = vsyncadd (!%p1100_p7), %s733_s20, 4294967040  ;;  %p21_p9 = scmp.ge.s32.totalorder %s1385_s13, 4   ;;  %s1655_s24 = smov %s1272_s25 }
 0x2f8   : > { %s1656_s25 = smov %s1276_s26  ;;  %s1657_s26 = smov %s1419_s18 }
 0x2f9   : > { %s1658_s27 = smov %s1385_s13  ;;  %23 = sbr.rel (!%p21_p9) target bundleno = 6 (0x6), region = 106 }
 0x300   :  { %738 = vsyncpa [#allocation3], 1 }
 0x301   :  { %740 = vsyncpa [#allocation3 + $0x1], 1 }
 0x302   :  { %741 = vsyncpa [#allocation6], 1 }
 0x303   :  { %742 = vsyncpa [#allocation4], 1 }
 0x304   :  { %744 = vsyncpa [#allocation4 + $0x1], 1 }

</bundles_post_ra>
